<compile_context>
chip_gen: v7x
topology: tpu7x:2x2x1
jax: 0.10.0
libtpu: 0.0.40
codegen_flags: <defaults>
</compile_context>

<pallas_src>
import functools

import jax
import jax.numpy as jnp
from jax.experimental import pallas as pl
from jax.experimental.pallas import tpu as pltpu


# ----------------------------------------------------------------------------
# Tiling helpers
# ----------------------------------------------------------------------------
def _round_up(x, m):
    return (x + m - 1) // m * m


_TN_MAX = 512   # 9216x512 bf16 weight block = 9 MiB -> 18 MiB double-buffered;
                # fits v7x's 64 MiB physical VMEM with headroom while
                # collapsing each FC layer into 8 grid steps.


def _pick_tm(m):
    """Row tile: full-dim block when small (no padding, exempt from the
    8-sublane rule), two sublane-aligned steps for mid-size M (even parallel
    extent so both v7x TensorCores get work), 256 otherwise."""
    if m <= 256:
        return m
    if m < 1024:
        return _round_up(-(-m // 2), 16)   # ceil(m/2), bf16 sublane-packed
    return 256


def _pick_tn(n):
    """Column tile: full N when it fits, else the largest 128-multiple
    <= _TN_MAX minimizing padding."""
    if n <= _TN_MAX:
        return n
    best_pad, best_t = None, 128
    for t in range(_TN_MAX, 127, -128):
        pad = _round_up(n, t) - n
        if best_pad is None or pad < best_pad:
            best_pad, best_t = pad, t
    return best_t


# ----------------------------------------------------------------------------
# Pallas kernel: one fused MXU step    y = [relu](x @ w + b)  -> out dtype
#   Full-K blocks => no reduction grid axis, no scratch accumulator.
# ----------------------------------------------------------------------------
def _matmul_bias_act_kernel(x_ref, w_ref, b_ref, o_ref, *, apply_relu):
    y = jnp.dot(x_ref[...], w_ref[...], preferred_element_type=jnp.float32)
    y = y + b_ref[...]                       # (tm, tn) + (1, tn)
    if apply_relu:
        y = jnp.maximum(y, 0.0)
    o_ref[...] = y.astype(o_ref.dtype)


def linear_pallas(x, lin, *, relu, out_dtype=jnp.float32):
    """y = relu(x @ W + b).  x: (M, K); W stored once as bf16 (K, N)."""
    M, K = x.shape
    w_kn, b = lin["w"], lin["b"]
    N, tn = lin["N"], lin["tn"]
    assert w_kn.shape == (K, N), (w_kn.shape, (K, N))

    tm = _pick_tm(M)
    grid = (pl.cdiv(M, tm), pl.cdiv(N, tn))

    xb = x.astype(jnp.bfloat16)
    out_bytes = jnp.dtype(out_dtype).itemsize
    # Double-buffered footprint of all blocks + headroom; raise v5e's 16 MiB
    # default, stay <= 48 MiB so v7x (64 MiB physical) keeps headroom.
    block_bytes = tm * K * 2 + K * tn * 2 + tn * 4 + tm * tn * out_bytes
    vmem_limit = int(min(max(2 * block_bytes + (8 << 20), 32 << 20), 48 << 20))

    kernel = functools.partial(_matmul_bias_act_kernel, apply_relu=relu)
    return pl.pallas_call(
        kernel,
        out_shape=jax.ShapeDtypeStruct((M, N), out_dtype),
        grid_spec=pltpu.PrefetchScalarGridSpec(
            num_scalar_prefetch=0,
            grid=grid,
            in_specs=[
                pl.BlockSpec((tm, K), lambda i, j: (i, 0)),   # activations
                pl.BlockSpec((K, tn), lambda i, j: (0, j)),   # weights (stream)
                pl.BlockSpec((1, tn), lambda i, j: (0, j)),   # bias
            ],
            out_specs=pl.BlockSpec((tm, tn), lambda i, j: (i, j)),
        ),
        compiler_params=pltpu.CompilerParams(
            dimension_semantics=("parallel", "parallel"),
            vmem_limit_bytes=vmem_limit,
        ),
        cost_estimate=pl.CostEstimate(
            flops=2 * M * K * N,
            transcendentals=0,
            bytes_accessed=M * K * 2 + K * N * 2 + N * 4 + M * N * out_bytes,
        ),
    )(xb, w_kn, b)


# ----------------------------------------------------------------------------
# Conv2d (+ fused bias/ReLU) via single-op im2col + the Pallas matmul kernel.
# Output is bf16 straight from the kernel (lane-dense NHWC, Cout on lanes).
# ----------------------------------------------------------------------------
def conv2d_relu_pallas(x_nhwc, conv):
    n = x_nhwc.shape[0]
    kh, kw, s, p = conv["kh"], conv["kw"], conv["stride"], conv["pad"]
    patches = jax.lax.conv_general_dilated_patches(
        x_nhwc,
        filter_shape=(kh, kw),
        window_strides=(s, s),
        padding=((p, p), (p, p)),
        dimension_numbers=("NHWC", "HWIO", "NHWC"),
    )                                              # (N, Ho, Wo, Cin*KH*KW)
    _, ho, wo, k = patches.shape
    y = linear_pallas(patches.reshape(n * ho * wo, k), conv["lin"],
                      relu=True, out_dtype=jnp.bfloat16)
    return y.reshape(n, ho, wo, -1)


def maxpool2d_nhwc(x, k=3, s=2):
    # Layout glue (memory-bound, negligible next to the matmuls).
    return jax.lax.reduce_window(
        x, jnp.array(-jnp.inf, x.dtype), jax.lax.max,
        window_dimensions=(1, k, k, 1),
        window_strides=(1, s, s, 1),
        padding="VALID")


# ----------------------------------------------------------------------------
# Parameters (deterministic synthetic init — no checkpoint load).
# Weights stored once: transposed to (K, N), bf16, no padding needed.
# ----------------------------------------------------------------------------
def _prep_linear(w_nk, b_n):
    n_out, _ = w_nk.shape
    w_kn = jnp.asarray(w_nk, jnp.float32).T.astype(jnp.bfloat16)
    b = jnp.asarray(b_n, jnp.float32).reshape(1, n_out)
    return {"w": w_kn, "b": b, "N": n_out, "tn": _pick_tn(n_out)}


def init_params(key):
    # AlexNet feature extractor conv configs: (Cin, Cout, K, stride, pad)
    conv_cfgs = [
        (3, 64, 11, 4, 2),
        (64, 192, 5, 1, 2),
        (192, 384, 3, 1, 1),
        (384, 256, 3, 1, 1),
        (256, 256, 3, 1, 1),
    ]
    params = {"convs": [], "fcs": []}
    keys = jax.random.split(key, len(conv_cfgs) + 2)
    for i, (cin, cout, k, s, p) in enumerate(conv_cfgs):
        fan_in = cin * k * k
        w = jax.random.normal(keys[i], (cout, cin, k, k), jnp.float32) / jnp.sqrt(fan_in)
        b = jnp.zeros((cout,), jnp.float32)
        # OIHW -> (Cout, Cin*KH*KW): matches the patch feature order (C, KH, KW)
        lin = _prep_linear(w.reshape(cout, fan_in), b)
        params["convs"].append({"lin": lin, "kh": k, "kw": k, "stride": s, "pad": p})

    # classifier: Linear(256*6*6, 4096), Linear(4096, 4096)
    c, h, w_ = 256, 6, 6
    w1 = jax.random.normal(keys[-2], (4096, c * h * w_), jnp.float32) / jnp.sqrt(c * h * w_)
    # Fold the PyTorch (C,H,W) flatten order into FC1's rows so the runtime
    # feature map can be flattened directly from NHWC (no transpose op).
    w1_hwc = w1.reshape(4096, c, h, w_).transpose(0, 2, 3, 1).reshape(4096, c * h * w_)
    params["fcs"].append(_prep_linear(w1_hwc, jnp.zeros((4096,), jnp.float32)))

    w2 = jax.random.normal(keys[-1], (4096, 4096), jnp.float32) / jnp.sqrt(4096)
    params["fcs"].append(_prep_linear(w2, jnp.zeros((4096,), jnp.float32)))
    return params


# ----------------------------------------------------------------------------
# CNNExtractNet('alexnet') forward
# ----------------------------------------------------------------------------
def cnn_extract_net_forward(params, x_nchw):
    # NCHW -> NHWC once at the boundary; feature path is channels-last so
    # every Pallas output is lane-dense (Cout on the lane axis).
    x = x_nchw.transpose(0, 2, 3, 1).astype(jnp.bfloat16)

    c1, c2, c3, c4, c5 = params["convs"]
    f = conv2d_relu_pallas(x, c1)
    f = maxpool2d_nhwc(f, 3, 2)
    f = conv2d_relu_pallas(f, c2)
    f = maxpool2d_nhwc(f, 3, 2)
    f = conv2d_relu_pallas(f, c3)
    f = conv2d_relu_pallas(f, c4)
    f = conv2d_relu_pallas(f, c5)
    f = maxpool2d_nhwc(f, 3, 2)                      # (N, 6, 6, 256) bf16

    # NHWC flatten; FC1's weight rows were permuted at init to accept it.
    f = f.reshape(f.shape[0], 6 * 6 * 256)

    # classifier: Dropout (identity), Linear, ReLU, Dropout, Linear, ReLU
    # TODO(synk): nn.Dropout train-mode masking not implemented (eval semantics).
    fc1, fc2 = params["fcs"]
    y = linear_pallas(f, fc1, relu=True, out_dtype=jnp.bfloat16)
    y = linear_pallas(y, fc2, relu=True, out_dtype=jnp.float32)
    return y                                          # (N, 4096) f32


# ----------------------------------------------------------------------------
# One-off correctness check of the im2col feature ordering vs. a real conv.
# ----------------------------------------------------------------------------
def _self_test_conv():
    key = jax.random.PRNGKey(42)
    kx, kw = jax.random.split(key)
    cin, cout, k, s, p = 3, 16, 3, 1, 1
    x = jax.random.normal(kx, (1, 8, 8, cin), jnp.float32)
    w = jax.random.normal(kw, (cout, cin, k, k), jnp.float32) * 0.1
    b = jnp.linspace(-0.5, 0.5, cout, dtype=jnp.float32)
    conv = {"lin": _prep_linear(w.reshape(cout, cin * k * k), b),
            "kh": k, "kw": k, "stride": s, "pad": p}
    got = conv2d_relu_pallas(x.astype(jnp.bfloat16), conv).astype(jnp.float32)
    ref = jax.lax.conv_general_dilated(
        x, w.transpose(2, 3, 1, 0),                  # OIHW -> HWIO
        window_strides=(s, s), padding=((p, p), (p, p)),
        dimension_numbers=("NHWC", "HWIO", "NHWC"))
    ref = jnp.maximum(ref + b, 0.0)
    err = float(jnp.max(jnp.abs(got - ref)))
    assert jnp.allclose(got, ref, atol=0.05, rtol=0.05), err


if __name__ == "__main__":
    _self_test_conv()

    key = jax.random.PRNGKey(0)
    pkey, xkey = jax.random.split(key)
    params = init_params(pkey)

    # batch=2; spatial must be 224 so the AlexNet feature stack yields
    # 256*6*6, which the module's .view hard-codes.
    x = jax.random.normal(xkey, (2, 3, 224, 224), jnp.float32)

    fwd = jax.jit(lambda xx: cnn_extract_net_forward(params, xx))
    y = jax.block_until_ready(fwd(x))

    assert y.shape == (2, 4096), y.shape
    assert bool(jnp.all(jnp.isfinite(y)))
    print("KERNEL_OK")
</pallas_src>

<mosaic_0001>
module attributes {stable_mosaic.version = 11 : i64} {
  func.func @_matmul_bias_act_kernel(%arg0: i32, %arg1: i32, %arg2: memref<64x27xbf16, #tpu.memory_space<vmem>>, %arg3: memref<27x16xbf16, #tpu.memory_space<vmem>>, %arg4: memref<1x16xf32, #tpu.memory_space<vmem>>, %arg5: memref<64x16xbf16, #tpu.memory_space<vmem>>) attributes {dimension_semantics = [#tpu.dimension_semantics<parallel>, #tpu.dimension_semantics<parallel>], iteration_bounds = array<i64: 1, 1>, scalar_prefetch = 0 : i64, scratch_operands = 0 : i64, tpu.core_type = #tpu.core_type<tc>, window_params = [{transform_indices = @transform_0, window_bounds = array<i64: 64, 27>}, {transform_indices = @transform_1, window_bounds = array<i64: 27, 16>}, {transform_indices = @transform_2, window_bounds = array<i64: 1, 16>}, {transform_indices = @transform_3, window_bounds = array<i64: 64, 16>}]} {
    %c0 = arith.constant 0 : index
    %c0_0 = arith.constant 0 : index
    %0 = vector.load %arg2[%c0, %c0_0] : memref<64x27xbf16, #tpu.memory_space<vmem>>, vector<64x27xbf16>
    %c0_1 = arith.constant 0 : index
    %c0_2 = arith.constant 0 : index
    %1 = vector.load %arg3[%c0_1, %c0_2] : memref<27x16xbf16, #tpu.memory_space<vmem>>, vector<27x16xbf16>
    %cst = arith.constant dense<0.000000e+00> : vector<64x16xf32>
    %2 = tpu.matmul %0, %1, %cst {dimension_numbers = #tpu.dot_dimension_numbers<[1], [0], [0], [1], [0, 0, 1, 1], [], []>} : vector<64x27xbf16>, vector<27x16xbf16>, vector<64x16xf32> -> vector<64x16xf32>
    %c0_3 = arith.constant 0 : index
    %c0_4 = arith.constant 0 : index
    %3 = vector.load %arg4[%c0_3, %c0_4] : memref<1x16xf32, #tpu.memory_space<vmem>>, vector<1x16xf32>
    %4 = vector.broadcast %3 : vector<1x16xf32> to vector<64x16xf32>
    %5 = arith.addf %2, %4 : vector<64x16xf32>
    %cst_5 = arith.constant 0.000000e+00 : f32
    %6 = vector.broadcast %cst_5 : f32 to vector<64x16xf32>
    %7 = arith.maximumf %5, %6 : vector<64x16xf32>
    %8 = arith.truncf %7 : vector<64x16xf32> to vector<64x16xbf16>
    %c0_6 = arith.constant 0 : index
    %c0_7 = arith.constant 0 : index
    %9 = vector.load %arg5[%c0_6, %c0_7] : memref<64x16xbf16, #tpu.memory_space<vmem>>, vector<64x16xbf16>
    tpu.vector_store %arg5[%c0_6, %c0_7], %8 {strides = array<i32>} : memref<64x16xbf16, #tpu.memory_space<vmem>>, vector<64x16xbf16>,
    return
  }
  func.func @transform_0(%arg0: i32, %arg1: i32) -> (i32, i32) {
    %c0_i32 = arith.constant 0 : i32
    %c0_i32_0 = arith.constant 0 : i32
    return %arg0, %c0_i32 : i32, i32
  }
  func.func @transform_1(%arg0: i32, %arg1: i32) -> (i32, i32) {
    %c0_i32 = arith.constant 0 : i32
    %c0_i32_0 = arith.constant 0 : i32
    return %c0_i32, %arg1 : i32, i32
  }
  func.func @transform_2(%arg0: i32, %arg1: i32) -> (i32, i32) {
    %c0_i32 = arith.constant 0 : i32
    %c0_i32_0 = arith.constant 0 : i32
    return %c0_i32, %arg1 : i32, i32
  }
  func.func @transform_3(%arg0: i32, %arg1: i32) -> (i32, i32) {
    %c0_i32 = arith.constant 0 : i32
    return %arg0, %arg1 : i32, i32
  }
}

</mosaic_0001>

<bundles_post_ra>
// kernel: tpu_custom_call.1
= control target key start
LH: loop header
LB: loop body
LE: loop exit
PB: predicated region body
PF: predicated region fallthrough
CT: control target
= control target key end

     0   :  { %vm78_vm0 = vcmask 1044480   ;;  %vm79_vm1 = vcmask 1045504   ;;  %vm65_vm2 = vcmask 220160   ;;  %v259_v1 = vmov 65535   ;;  %s337_s1 = inlined_call_operand.vmem [shape: bf16[27,16], index: 1, kind: input, shape index: {}]   ;;  %s338_s0 = inlined_call_operand.vmem [shape: bf16[64,27], index: 0, kind: input, shape index: {}]   ;;  %s339_s2 = inlined_call_operand.vmem [shape: f32[1,16], index: 2, kind: input, shape index: {}]   ;;  %s340_s3 = inlined_call_operand.vmem [shape: bf16[64,16], index: 3, kind: output, shape index: {}]  }
   0x1   :  { %v253_v0 = vld [vmem:[%s337_s1] sm:$0xff]   ;;  %v80_v2 = vsel %vm78_vm0, 4294967295, %v259_v1  ;;  %v254_v3 = vld [vmem:[%s337_s1 + $0x8] sm:$0x3f]   ;;  %v256_v7 = vld [vmem:[%s338_s0 + $0x10] sm:$0xff]   ;;  %vm190_vm3 = vcmask 125952  }
   0x2   :  { %236 = vmatprep.subr.bf16.mxu0 %v253_v0  ;;  %248 = vmatprep.subr.bf16.mxu1 %v253_v0  ;;  %v81_v4 = vsel %vm79_vm1, %v80_v2, 0  ;;  %v255_v5 = vld [vmem:[%s338_s0] sm:$0xff]   ;;  %v257_v8 = vld [vmem:[%s338_s0 + $0x8] sm:$0xff]   ;;  %v258_v9 = vld [vmem:[%s338_s0 + $0x18] sm:$0xff]  }
   0x3   :  { %237 = vmatpush3.bf16.msra.mxu0 %v253_v0  ;;  %250 = vmatpush3.bf16.msra.mxu1 %v253_v0  ;;  %v83_v6 = vand.u32 %v254_v3, %v81_v4  ;;  %v203_v10 = vld [vmem:[%s339_s2] ss:$0 sm:$0xff] }
   0x4   :  { %240 = vmatprep.mubr.msk.bf16.mxu0 %vm65_vm2, %v255_v5  ;;  %244 = vmatprep.mubr.msk.bf16.mxu1 %vm65_vm2, %v256_v7 }
   0x5   :  { %238 = vmatprep.subr.bf16.mxu0 %v83_v6  ;;  %249 = vmatprep.subr.bf16.mxu1 %v83_v6 }
   0x7   :  { %239 = vmatpush3.bf16.msra.mxu0 %v83_v6  ;;  %251 = vmatpush3.bf16.msra.mxu1 %v83_v6 }
   0xa   :  { %241 = vmatmul.mubr.msk.bf16.vlgmr.msra.gmra.mrb[0].mxu0 %vm65_vm2, %v257_v8  ;;  %245 = vmatmul.mubr.msk.bf16.vlgmr.msra.gmra.mrb[0].mxu1 %vm65_vm2, %v258_v9 }
  0xdd   :  { %v242_v11 = vpop.f32.mrb[0].mxu0  ;;  %v246_v12 = vpop.f32.mrb[0].mxu1 }
  0xde   :  { %v128_v13 = vadd.f32 %v242_v11, %v203_v10  ;;  %v144_v14 = vadd.f32 %v246_v12, %v203_v10  ;;  %v119_v15 = vpop.f32.mrb[1].mxu0  ;;  %v135_v16 = vpop.f32.mrb[1].mxu1 }
  0xdf   :  { %v120_v17 = vadd.f32 %v203_v10, %v119_v15  ;;  %v136_v18 = vadd.f32 %v203_v10, %v135_v16  ;;  %v243_v19 = vpop.f32.mrb[2].mxu0  ;;  %v247_v20 = vpop.f32.mrb[2].mxu1 }
  0xe0   :  { %v152_v21 = vmax.f32 %v128_v13, 0.0  ;;  %v156_v22 = vmax.f32 %v144_v14, 0.0  ;;  %v131_v23 = vadd.f32 %v243_v19, %v203_v10  ;;  %v147_v24 = vadd.f32 %v247_v20, %v203_v10  ;;  %v122_v25 = vpop.f32.mrb[3].mxu0  ;;  %v138_v26 = vpop.f32.mrb[3].mxu1 }
  0xe1   :  { %v150_v27 = vmax.f32 %v120_v17, 0.0  ;;  %v154_v28 = vmax.f32 %v136_v18, 0.0  ;;  %v123_v29 = vadd.f32 %v203_v10, %v122_v25  ;;  %v139_v30 = vadd.f32 %v203_v10, %v138_v26 }
  0xe2   :  { %v224_v31 = vpack.c.bf16 %v152_v21, %v152_v21  ;;  %v228_v32 = vpack.c.bf16 %v156_v22, %v156_v22  ;;  %v153_v33 = vmax.f32 %v131_v23, 0.0  ;;  %v157_v34 = vmax.f32 %v147_v24, 0.0 }
  0xe3   :  { %v222_v35 = vpack.c.bf16 %v150_v27, %v150_v27  ;;  %v226_v36 = vpack.c.bf16 %v154_v28, %v154_v28  ;;  %v151_v37 = vmax.f32 %v123_v29, 0.0  ;;  %v155_v38 = vmax.f32 %v139_v30, 0.0 }
  0xe4   :  { %193 = vst.msk [vmem:[%s340_s3 + $0x8] sm:$0xf] %vm190_vm3, %v224_v31  ;;  %197 = vst.msk [vmem:[%s340_s3 + $0x18] sm:$0xf] %vm190_vm3, %v228_v32  ;;  %v225_v39 = vpack.c.bf16 %v153_v33, %v153_v33  ;;  %v229_v40 = vpack.c.bf16 %v157_v34, %v157_v34 }
  0xe5   :  { %191 = vst.msk [vmem:[%s340_s3] sm:$0xf] %vm190_vm3, %v222_v35  ;;  %195 = vst.msk [vmem:[%s340_s3 + $0x10] sm:$0xf] %vm190_vm3, %v226_v36  ;;  %v223_v41 = vpack.c.bf16 %v151_v37, %v151_v37  ;;  %v227_v42 = vpack.c.bf16 %v155_v38, %v155_v38 }
  0xe6   :  { %194 = vst.msk [vmem:[%s340_s3 + $0xc] sm:$0xf] %vm190_vm3, %v225_v39  ;;  %198 = vst.msk [vmem:[%s340_s3 + $0x1c] sm:$0xf] %vm190_vm3, %v229_v40 }
  0xe7   :  { %192 = vst.msk [vmem:[%s340_s3 + $0x4] sm:$0xf] %vm190_vm3, %v223_v41  ;;  %196 = vst.msk [vmem:[%s340_s3 + $0x14] sm:$0xf] %vm190_vm3, %v227_v42 }

</bundles_post_ra>
